<compile_context>
chip_gen: v7x
topology: tpu7x:2x2x1
jax: 0.10.0
libtpu: 0.0.40
codegen_flags: <defaults>
</compile_context>

<pallas_src>
import jax
import jax.numpy as jnp
from jax.experimental import pallas as pl
from jax.experimental.pallas import tpu as pltpu

_EPS = 1e-5


def _make_kernel(input_dim, a_off, action_size, fc1, fc2):
    """Builds the single-tile kernel with all dims closed over statically.

    Kernel refs (all full-array VMEM blocks, transposed feature x batch):
      xa_ref  : (a_off + A, B)  rows [0, input_dim) = input_^T,
                                rows [a_off, a_off+A) = action^T (8-aligned).
      w1_ref  : (fc1, input_dim)  fc1 weight with BN1 gamma folded in.
      w2h_ref : (fc2, fc1)        fc2 weight block acting on h.
      slab_ref: (P, A + 5), P = max(fc1, fc2):
                cols [0, A)  = fc2 weight block acting on action,
                col A        = bn2 gamma,   col A+1 = bn2 beta,
                col A+2      = fc2 bias,    col A+3 = fc5 weight,
                col A+4 row0 = fc5 bias.
      out_ref : (1, B) lane-dense Q-value row.
    """
    A = action_size

    def kernel(xa_ref, w1_ref, w2h_ref, slab_ref, out_ref):
        B = xa_ref.shape[1]
        inv_b = 1.0 / B

        # ---- BN1 (training mode), fused single-pass stats. gamma is folded
        # into w1; beta and the fc1 bias cancel under BN2's mean subtraction.
        x = xa_ref[:input_dim, :]                                  # (D, B)
        mu = jnp.sum(x, axis=1, keepdims=True) * inv_b             # (D, 1)
        ex2 = jnp.sum(x * x, axis=1, keepdims=True) * inv_b
        var = ex2 - mu * mu
        x_hat = (x - mu) * jax.lax.rsqrt(var + _EPS)               # (D, B)

        # ---- fc1 (bias-free, gamma-folded): (fc1, D) @ (D, B) on the MXU.
        h = jnp.dot(w1_ref[...], x_hat,
                    preferred_element_type=jnp.float32)            # (fc1, B)

        # ---- BN2 fused: scale = gamma * rsqrt(var+eps); shift = beta - scale*mu.
        # Single stats pass + single FMA pass over (fc1, B), then ReLU.
        slab = slab_ref[...]
        mu2 = jnp.sum(h, axis=1, keepdims=True) * inv_b            # (fc1, 1)
        ex2_2 = jnp.sum(h * h, axis=1, keepdims=True) * inv_b
        var2 = ex2_2 - mu2 * mu2
        gamma2 = slab[:fc1, A:A + 1]
        beta2 = slab[:fc1, A + 1:A + 2]
        scale = gamma2 * jax.lax.rsqrt(var2 + _EPS)                # (fc1, 1)
        shift = beta2 - scale * mu2
        h = jnp.maximum(h * scale + shift, 0.0)                    # (fc1, B)

        # ---- fc2 as two matmuls summed (no in-kernel concat), then ReLU.
        a = xa_ref[a_off:a_off + A, :]                             # (A, B)
        w2a = slab[:fc2, :A]                                       # (fc2, A)
        b2 = slab[:fc2, A + 2:A + 3]                               # (fc2, 1)
        z = (jnp.dot(w2h_ref[...], h, preferred_element_type=jnp.float32)
             + jnp.dot(w2a, a, preferred_element_type=jnp.float32)
             + b2)
        z = jnp.maximum(z, 0.0)                                    # (fc2, B)

        # ---- fc5: (1, fc2) x (fc2, B) replaced by a multiply + sublane reduce.
        w5 = slab[:fc2, A + 3:A + 4]                               # (fc2, 1)
        b5 = slab[0:1, A + 4:A + 5]                                # (1, 1)
        q = jnp.sum(z * w5, axis=0, keepdims=True) + b5            # (1, B)
        out_ref[...] = q.astype(out_ref.dtype)

    return kernel


def prepare_params(params):
    """One-time weight preparation (call when params change, NOT per forward).

    Folds BN1 gamma into the fc1 weight, splits the fc2 weight into its
    h-block and action-block, and packs the action-block together with all
    small per-feature parameters into a single slab (one DMA operand).
    """
    fc1, input_dim = params["w1"].shape
    fc2, k2 = params["w2"].shape
    A = k2 - fc1
    P = max(fc1, fc2)

    # Fold BN1 gamma into fc1's input-feature columns (PyTorch (out, in) layout).
    w1t = (params["w1"] * params["bn_gamma"][None, :]).astype(jnp.float32)
    # NOTE: params["bn_beta"] and params["b1"] are intentionally dropped: they
    # are per-feature constants before BN2 and cancel under its batch-mean
    # subtraction (training-mode BN only).

    w2ht = params["w2"][:, :fc1].astype(jnp.float32)               # (fc2, fc1)
    w2at = params["w2"][:, fc1:].astype(jnp.float32)               # (fc2, A)

    def _col(v):
        v = jnp.asarray(v, jnp.float32).reshape(-1, 1)
        return jnp.pad(v, ((0, P - v.shape[0]), (0, 0)))

    slab = jnp.concatenate(
        [jnp.pad(w2at, ((0, P - fc2), (0, 0))),   # cols [0, A)
         _col(params["bn2_gamma"]),               # col A
         _col(params["bn2_beta"]),                # col A+1
         _col(params["b2"]),                      # col A+2
         _col(params["w5"].reshape(-1)),          # col A+3
         _col(params["b5"].reshape(-1))],         # col A+4 (row 0)
        axis=1)

    return {"w1t": w1t, "w2ht": w2ht, "slab": slab}


@jax.jit
def critic_forward(input_, action, w1t, w2ht, slab):
    """Critic forward pass as a single-tile Pallas kernel.

    input_: (B, 2*state_size + action_size) f32
    action: (B, action_size) f32
    w1t/w2ht/slab: outputs of prepare_params (hoisted weight prep).
    Returns (B, 1) Q-values.
    """
    B, input_dim = input_.shape
    A = action.shape[1]
    fc1 = w1t.shape[0]
    fc2 = w2ht.shape[0]

    # Pack [input_ | zero-pad | action] and transpose to feature x batch so the
    # action block starts at an 8-aligned sublane offset inside one operand.
    pad = (-input_dim) % 8
    a_off = input_dim + pad
    xa = jnp.concatenate(
        [input_, jnp.zeros((B, pad), input_.dtype), action], axis=1).T

    vmem = pl.BlockSpec(memory_space=pltpu.MemorySpace.VMEM)
    q_row = pl.pallas_call(
        _make_kernel(input_dim, a_off, A, fc1, fc2),
        out_shape=jax.ShapeDtypeStruct((1, B), jnp.float32),
        in_specs=[vmem] * 4,
        out_specs=vmem,
    )(xa.astype(jnp.float32), w1t, w2ht, slab)

    return q_row.reshape(B, 1)


def init_params(key, state_size, action_size, fc1, fc2):
    """Deterministic synthetic parameters, PyTorch-native (out, in) layouts.

    BN gamma/beta are randomized (instead of 1/0) so the gamma-folding and
    beta/b1 cancellation optimizations are exercised non-trivially.
    """
    input_dim = 2 * state_size + action_size
    ks = jax.random.split(key, 10)

    def uniform_fan_in(k, shape, fan_in):
        lim = 1.0 / jnp.sqrt(jnp.float32(fan_in))
        return jax.random.uniform(k, shape, jnp.float32, -lim, lim)

    return {
        "bn_gamma": jax.random.uniform(ks[0], (input_dim,), jnp.float32, 0.5, 1.5),
        "bn_beta": jax.random.uniform(ks[1], (input_dim,), jnp.float32, -0.5, 0.5),
        "w1": uniform_fan_in(ks[2], (fc1, input_dim), input_dim),
        "b1": uniform_fan_in(ks[3], (fc1,), input_dim),
        "bn2_gamma": jax.random.uniform(ks[4], (fc1,), jnp.float32, 0.5, 1.5),
        "bn2_beta": jax.random.uniform(ks[5], (fc1,), jnp.float32, -0.5, 0.5),
        "w2": uniform_fan_in(ks[6], (fc2, fc1 + action_size), fc1 + action_size),
        "b2": uniform_fan_in(ks[7], (fc2,), fc1 + action_size),
        # fc5 explicitly initialized uniform(-3e-4, 3e-4) in the module.
        "w5": jax.random.uniform(ks[8], (1, fc2), jnp.float32, -3e-4, 3e-4),
        "b5": jax.random.uniform(ks[9], (1,), jnp.float32, -3e-4, 3e-4),
    }


def _reference(input_, action, p):
    """Pure-JAX reference implementing the FULL module forward (including the
    terms the kernel drops algebraically), in the standard (batch, feature)
    layout with PyTorch-native weight shapes."""
    def bn(x, g, b):
        mu = jnp.mean(x, axis=0, keepdims=True)
        var = jnp.mean((x - mu) ** 2, axis=0, keepdims=True)
        return (x - mu) / jnp.sqrt(var + _EPS) * g + b

    x = bn(input_, p["bn_gamma"], p["bn_beta"])
    h = x @ p["w1"].T + p["b1"]
    h = jax.nn.relu(bn(h, p["bn2_gamma"], p["bn2_beta"]))
    cat = jnp.concatenate([h, action], axis=1)
    z = jax.nn.relu(cat @ p["w2"].T + p["b2"])
    return z @ p["w5"].T + p["b5"]


if __name__ == "__main__":
    # Small shapes consistent with the module: state_size=8, action_size=4.
    state_size, action_size, fc1, fc2 = 8, 4, 32, 32
    batch = 8
    input_dim = 2 * state_size + action_size

    key = jax.random.PRNGKey(0)
    k_in, k_act, k_par = jax.random.split(key, 3)
    input_ = jax.random.normal(k_in, (batch, input_dim), jnp.float32)
    action = jax.random.normal(k_act, (batch, action_size), jnp.float32)
    params = init_params(k_par, state_size, action_size, fc1, fc2)

    # One-time weight prep (gamma fold, W2 split, slab pack) -- hoisted out of
    # the per-call path, as it would be after each optimizer step.
    prep = prepare_params(params)

    out = jax.block_until_ready(
        critic_forward(input_, action, prep["w1t"], prep["w2ht"], prep["slab"]))
    ref = _reference(input_, action, params)

    assert out.shape == (batch, 1)
    assert jnp.allclose(out, ref, atol=1e-5, rtol=1e-4), (out, ref)

    print("KERNEL_OK")
</pallas_src>

<mosaic_0001>
module attributes {stable_mosaic.version = 11 : i64} {
  func.func @kernel(%arg0: memref<28x8xf32, #tpu.memory_space<vmem>>, %arg1: memref<32x20xf32, #tpu.memory_space<vmem>>, %arg2: memref<32x32xf32, #tpu.memory_space<vmem>>, %arg3: memref<32x9xf32, #tpu.memory_space<vmem>>, %arg4: memref<1x8xf32, #tpu.memory_space<vmem>>) attributes {dimension_semantics = [], scalar_prefetch = 0 : i64, scratch_operands = 0 : i64, tpu.core_type = #tpu.core_type<tc>} {
    %c0 = arith.constant 0 : index
    %c0_0 = arith.constant 0 : index
    %0 = vector.load %arg0[%c0, %c0_0] : memref<28x8xf32, #tpu.memory_space<vmem>>, vector<20x8xf32>
    %cst = arith.constant dense<0.000000e+00> : vector<20xf32>
    %1 = vector.multi_reduction <add>, %0, %cst [1] : vector<20x8xf32> to vector<20xf32>
    %2 = vector.shape_cast %1 : vector<20xf32> to vector<20x1xf32>
    %cst_1 = arith.constant 1.250000e-01 : f32
    %3 = vector.broadcast %cst_1 : f32 to vector<20x1xf32>
    %4 = arith.mulf %2, %3 : vector<20x1xf32>
    %5 = arith.mulf %0, %0 : vector<20x8xf32>
    %cst_2 = arith.constant dense<0.000000e+00> : vector<20xf32>
    %6 = vector.multi_reduction <add>, %5, %cst_2 [1] : vector<20x8xf32> to vector<20xf32>
    %7 = vector.shape_cast %6 : vector<20xf32> to vector<20x1xf32>
    %cst_3 = arith.constant 1.250000e-01 : f32
    %8 = vector.broadcast %cst_3 : f32 to vector<20x1xf32>
    %9 = arith.mulf %7, %8 : vector<20x1xf32>
    %10 = arith.mulf %4, %4 : vector<20x1xf32>
    %11 = arith.subf %9, %10 : vector<20x1xf32>
    %12 = vector.broadcast %4 : vector<20x1xf32> to vector<20x8xf32>
    %13 = arith.subf %0, %12 : vector<20x8xf32>
    %cst_4 = arith.constant 9.99999974E-6 : f32
    %14 = vector.broadcast %cst_4 : f32 to vector<20x1xf32>
    %15 = arith.addf %11, %14 : vector<20x1xf32>
    %16 = math.rsqrt %15 : vector<20x1xf32>
    %17 = vector.broadcast %16 : vector<20x1xf32> to vector<20x8xf32>
    %18 = arith.mulf %13, %17 : vector<20x8xf32>
    %c0_5 = arith.constant 0 : index
    %c0_6 = arith.constant 0 : index
    %19 = vector.load %arg1[%c0_5, %c0_6] : memref<32x20xf32, #tpu.memory_space<vmem>>, vector<32x20xf32>
    %cst_7 = arith.constant dense<0.000000e+00> : vector<32x8xf32>
    %20 = tpu.matmul %19, %18, %cst_7 {dimension_numbers = #tpu.dot_dimension_numbers<[1], [0], [0], [1], [0, 0, 1, 1], [], []>} : vector<32x20xf32>, vector<20x8xf32>, vector<32x8xf32> -> vector<32x8xf32>
    %c0_8 = arith.constant 0 : index
    %c0_9 = arith.constant 0 : index
    %21 = vector.load %arg3[%c0_8, %c0_9] : memref<32x9xf32, #tpu.memory_space<vmem>>, vector<32x9xf32>
    %cst_10 = arith.constant dense<0.000000e+00> : vector<32xf32>
    %22 = vector.multi_reduction <add>, %20, %cst_10 [1] : vector<32x8xf32> to vector<32xf32>
    %23 = vector.shape_cast %22 : vector<32xf32> to vector<32x1xf32>
    %cst_11 = arith.constant 1.250000e-01 : f32
    %24 = vector.broadcast %cst_11 : f32 to vector<32x1xf32>
    %25 = arith.mulf %23, %24 : vector<32x1xf32>
    %26 = arith.mulf %20, %20 : vector<32x8xf32>
    %cst_12 = arith.constant dense<0.000000e+00> : vector<32xf32>
    %27 = vector.multi_reduction <add>, %26, %cst_12 [1] : vector<32x8xf32> to vector<32xf32>
    %28 = vector.shape_cast %27 : vector<32xf32> to vector<32x1xf32>
    %cst_13 = arith.constant 1.250000e-01 : f32
    %29 = vector.broadcast %cst_13 : f32 to vector<32x1xf32>
    %30 = arith.mulf %28, %29 : vector<32x1xf32>
    %31 = arith.mulf %25, %25 : vector<32x1xf32>
    %32 = arith.subf %30, %31 : vector<32x1xf32>
    %33 = vector.extract_strided_slice %21 {offsets = [0, 4], sizes = [32, 1], strides = [1, 1]} : vector<32x9xf32> to vector<32x1xf32>
    %34 = vector.extract_strided_slice %21 {offsets = [0, 5], sizes = [32, 1], strides = [1, 1]} : vector<32x9xf32> to vector<32x1xf32>
    %cst_14 = arith.constant 9.99999974E-6 : f32
    %35 = vector.broadcast %cst_14 : f32 to vector<32x1xf32>
    %36 = arith.addf %32, %35 : vector<32x1xf32>
    %37 = math.rsqrt %36 : vector<32x1xf32>
    %38 = arith.mulf %33, %37 : vector<32x1xf32>
    %39 = arith.mulf %38, %25 : vector<32x1xf32>
    %40 = arith.subf %34, %39 : vector<32x1xf32>
    %41 = vector.broadcast %38 : vector<32x1xf32> to vector<32x8xf32>
    %42 = arith.mulf %20, %41 : vector<32x8xf32>
    %43 = vector.broadcast %40 : vector<32x1xf32> to vector<32x8xf32>
    %44 = arith.addf %42, %43 : vector<32x8xf32>
    %cst_15 = arith.constant 0.000000e+00 : f32
    %45 = vector.broadcast %cst_15 : f32 to vector<32x8xf32>
    %46 = arith.maximumf %44, %45 : vector<32x8xf32>
    %c24 = arith.constant 24 : index
    %c0_16 = arith.constant 0 : index
    %47 = vector.load %arg0[%c24, %c0_16] : memref<28x8xf32, #tpu.memory_space<vmem>>, vector<4x8xf32>
    %48 = vector.extract_strided_slice %21 {offsets = [0, 0], sizes = [32, 4], strides = [1, 1]} : vector<32x9xf32> to vector<32x4xf32>
    %49 = vector.extract_strided_slice %21 {offsets = [0, 6], sizes = [32, 1], strides = [1, 1]} : vector<32x9xf32> to vector<32x1xf32>
    %c0_17 = arith.constant 0 : index
    %c0_18 = arith.constant 0 : index
    %50 = vector.load %arg2[%c0_17, %c0_18] : memref<32x32xf32, #tpu.memory_space<vmem>>, vector<32x32xf32>
    %cst_19 = arith.constant dense<0.000000e+00> : vector<32x8xf32>
    %51 = tpu.matmul %50, %46, %cst_19 {dimension_numbers = #tpu.dot_dimension_numbers<[1], [0], [0], [1], [0, 0, 1, 1], [], []>} : vector<32x32xf32>, vector<32x8xf32>, vector<32x8xf32> -> vector<32x8xf32>
    %cst_20 = arith.constant dense<0.000000e+00> : vector<32x8xf32>
    %52 = tpu.matmul %48, %47, %cst_20 {dimension_numbers = #tpu.dot_dimension_numbers<[1], [0], [0], [1], [0, 0, 1, 1], [], []>} : vector<32x4xf32>, vector<4x8xf32>, vector<32x8xf32> -> vector<32x8xf32>
    %53 = arith.addf %51, %52 : vector<32x8xf32>
    %54 = vector.broadcast %49 : vector<32x1xf32> to vector<32x8xf32>
    %55 = arith.addf %53, %54 : vector<32x8xf32>
    %cst_21 = arith.constant 0.000000e+00 : f32
    %56 = vector.broadcast %cst_21 : f32 to vector<32x8xf32>
    %57 = arith.maximumf %55, %56 : vector<32x8xf32>
    %58 = vector.extract_strided_slice %21 {offsets = [0, 7], sizes = [32, 1], strides = [1, 1]} : vector<32x9xf32> to vector<32x1xf32>
    %59 = vector.extract_strided_slice %21 {offsets = [0, 8], sizes = [1, 1], strides = [1, 1]} : vector<32x9xf32> to vector<1x1xf32>
    %60 = vector.broadcast %58 : vector<32x1xf32> to vector<32x8xf32>
    %61 = arith.mulf %57, %60 : vector<32x8xf32>
    %cst_22 = arith.constant dense<0.000000e+00> : vector<8xf32>
    %62 = vector.multi_reduction <add>, %61, %cst_22 [0] : vector<32x8xf32> to vector<8xf32>
    %63 = vector.shape_cast %62 : vector<8xf32> to vector<1x8xf32>
    %64 = vector.broadcast %59 : vector<1x1xf32> to vector<1x8xf32>
    %65 = arith.addf %63, %64 : vector<1x8xf32>
    %c0_23 = arith.constant 0 : index
    %c0_24 = arith.constant 0 : index
    %66 = vector.load %arg4[%c0_23, %c0_24] : memref<1x8xf32, #tpu.memory_space<vmem>>, vector<1x8xf32>
    tpu.vector_store %arg4[%c0_23, %c0_24], %65 {strides = array<i32>} : memref<1x8xf32, #tpu.memory_space<vmem>>, vector<1x8xf32>,
    return
  }
}

</mosaic_0001>

<bundles_post_ra>
// kernel: critic_forward.1
= control target key start
LH: loop header
LB: loop body
LE: loop exit
PB: predicated region body
PF: predicated region fallthrough
CT: control target
= control target key end

     0   :  { %vm21_vm0 = vcmask 64512   ;;  %s882_s0 = inlined_call_operand.vmem [shape: f32[28,8], index: 0, kind: input, shape index: {}]   ;;  %s883_s1 = inlined_call_operand.vmem [shape: f32[32,20], index: 1, kind: input, shape index: {}]   ;;  %s884_s2 = inlined_call_operand.vmem [shape: f32[32,32], index: 2, kind: input, shape index: {}]   ;;  %s885_s3 = inlined_call_operand.vmem [shape: f32[32,9], index: 3, kind: input, shape index: {}]   ;;  %s886_s4 = inlined_call_operand.hbm [shape: f32[1,8], index: 4, kind: output, shape index: {}]  }
   0x1   :  { %v18_v0 = vld [vmem:[%s882_s0] sm:$0xff]  ;;  %v19_v1 = vld [vmem:[%s882_s0 + $0x8] sm:$0xff] }
   0x2   :  { %v22_v2 = vsel %vm21_vm0, %v18_v0, 0.0  ;;  %v35_v3 = vmul.f32 %v18_v0, %v18_v0  ;;  %v36_v4 = vmul.f32 %v19_v1, %v19_v1 }
   0x3   :  { %9 = vsyncpa [#allocation3], 0  ;;  %23 = vadd.xlane.f32.xlu0 %v22_v2  ;;  %v20_v5 = vld [vmem:[%s882_s0 + $0x10] sm:$0xf]  ;;  %v25_v7 = vsel %vm21_vm0, %v19_v1, 0.0  ;;  %vm28_vm1 = vcmask 60416  }
   0x4   :  { %v38_v6 = vsel %vm21_vm0, %v35_v3, 0.0  ;;  %v41_v8 = vsel %vm21_vm0, %v36_v4, 0.0  ;;  %v37_v9 = vmul.f32 %v20_v5, %v20_v5  ;;  %v29_v10 = vsel %vm28_vm1, %v20_v5, 0.0  ;;  %v68_v12 = vld [vmem:[%s883_s1] sm:$0xff]  ;;  %v69_v44 = vld [vmem:[%s883_s1 + $0x8] sm:$0xff]  ;;  %v70_v45 = vld [vmem:[%s883_s1 + $0x10] sm:$0xff] }
   0x5   :  { %39 = vadd.xlane.f32.xlu1 %v38_v6  ;;  %vm72_vm2 = vcmask 162816   ;;  %vm85_vm3 = vcmask 1043456   ;;  %v71_v46 = vld [vmem:[%s883_s1 + $0x18] sm:$0xff]  ;;  %v730_v63 = vmov 4   ;;  %s731_s6 = smov 1   ;;  %vm315_vm4 = vcmask 31744  }
   0x6   :  { %v44_v11 = vsel %vm28_vm1, %v37_v9, 0.0  ;;  %632 = vmatprep.mubr.msk.f32.mxu0 %vm72_vm2, %v68_v12  ;;  %683 = vset.pattern.permute.xlu0 %v730_v63  ;;  %vm416_vm5 = vcmask 261120   ;;  %vm576_vm6 = vcmask 57344  }
   0x7   :  { %26 = vadd.xlane.f32.xlu0 %v25_v7  ;;  %684 = vset.pattern.permute.xlu1 %v730_v63 }
   0x9   :  { %42 = vadd.xlane.f32.xlu1 %v41_v8 }
   0xb   :  { %30 = vadd.xlane.f32.xlu0 %v29_v10 }
   0xd   :  { %45 = vadd.xlane.f32.xlu1 %v44_v11 }
  0x90   :  { %v24_v13 = vpop.xlane.xlu0 %23 }
  0x91   :  { %v32_v14 = vmul.f32 0.125, %v24_v13 }
  0x92   :  { %v40_v15 = vpop.xlane.xlu1 %39 }
  0x93   :  { %v50_v16 = vmul.f32 %v32_v14, %v32_v14  ;;  %v47_v17 = vmul.f32 0.125, %v40_v15  ;;  %v56_v35 = vsub.f32 %v18_v0, %v32_v14 }
  0x94   :  { %v27_v18 = vpop.xlane.xlu0 %26 }
  0x95   :  { %v53_v19 = vsub.f32 %v47_v17, %v50_v16  ;;  %v33_v20 = vmul.f32 0.125, %v27_v18 }
  0x96   :  { %v43_v21 = vpop.xlane.xlu1 %42 }
  0x97   :  { %v59_v22 = vadd.f32 1e-05, %v53_v19  ;;  %v51_v23 = vmul.f32 %v33_v20, %v33_v20  ;;  %v48_v24 = vmul.f32 0.125, %v43_v21  ;;  %v57_v36 = vsub.f32 %v19_v1, %v33_v20 }
  0x98   :  { %v31_v25 = vpop.xlane.xlu0 %30 }
  0x99   :  { %v54_v26 = vsub.f32 %v48_v24, %v51_v23  ;;  %v34_v27 = vmul.f32 0.125, %v31_v25  ;;  %692 = vrsqrt.f32 %v59_v22 }
  0x9a   :  { %v46_v28 = vpop.xlane.xlu1 %45 }
  0x9b   :  { %v60_v29 = vadd.f32 1e-05, %v54_v26  ;;  %v52_v30 = vmul.f32 %v34_v27, %v34_v27  ;;  %v49_v31 = vmul.f32 0.125, %v46_v28  ;;  %v58_v40 = vsub.f32 %v20_v5, %v34_v27  ;;  %v175_v28 = vld [vmem:[%s885_s3 + $0x8] sm:$0xff] }
  0x9d   :  { %694 = vrsqrt.f32 %v60_v29  ;;  %v55_v32 = vsub.f32 %v49_v31, %v52_v30  ;;  %v827_v29 = vld [vmem:[%s885_s3] sm:$0xff] }
  0x9e   :  { %640 = vmatprep.mubr.msk.f32.mxu1 %vm315_vm4, %v827_v29 }
  0x9f   :  { %v61_v33 = vadd.f32 1e-05, %v55_v32 }
  0xa1   :  { %696 = vrsqrt.f32 %v61_v33 }
  0xa3   :  { %v693_v34 = vpop.eup %692 }
  0xa4   :  { %v65_v38 = vmul.f32 %v693_v34, %v56_v35 }
  0xa7   :  { %v695_v37 = vpop.eup %694 }
  0xa8   :  { %v66_v39 = vmul.f32 %v695_v37, %v57_v36  ;;  %v176_v36 = vld [vmem:[%s885_s3 + $0x10] sm:$0xff] }
  0xaa   :  { %v660_v41 = vpack.c.bf16 %v66_v39, %v65_v38  ;;  %v177_v39 = vld [vmem:[%s885_s3 + $0x18] sm:$0xff] }
  0xab   :  { %v697_v42 = vpop.eup %696 }
  0xac   :  { %661 = vmatprep.subr.bf16.mxu0 %v660_v41  ;;  %v67_v43 = vmul.f32 %v697_v42, %v58_v40 }
  0xad   :  { %663 = vmatpush3.bf16.msra.mxu0 %v660_v41 }
  0xae   :  { %630 = vmatprep.subr.msk.mxu0 %vm85_vm3, %v67_v43 }
  0xb1   :  { %631 = vmatpush3.msk.msra.mxu0 %vm85_vm3, %v67_v43  ;;  %v732_v43 = vmov 5  }
  0xb2   :  { %633 = vmatmul.mubr.msk.f32.vlgmr.msra.gmra.mrb[0].mxu0 %vm72_vm2, %v69_v44 }
  0xb3   :  { %635 = vmatprep.mubr.msk.f32.mxu0 %vm72_vm2, %v70_v45 }
  0xb6   :  { %636 = vmatmul.mubr.msk.f32.gmra.mrb[2].mxu0 %vm72_vm2, %v71_v46 }
 0x185   :  { %v793_v47 = vpop.f32.mrb[0].mxu0 }
 0x186   :  { %v795_v48 = vpop.f32.mrb[1].mxu0  ;;  %v181_v49 = vsel %vm21_vm0, %v793_v47, 0.0  ;;  %v195_v50 = vmul.f32 %v793_v47, %v793_v47 }
 0x187   :  { %182 = vadd.xlane.f32.xlu1 %v181_v49  ;;  %v178_v51 = vsel %vm21_vm0, %v795_v48, 0.0  ;;  %v194_v52 = vmul.f32 %v795_v48, %v795_v48 }
 0x188   :  { %179 = vadd.xlane.f32.xlu0 %v178_v51  ;;  %v201_v54 = vsel %vm21_vm0, %v195_v50, 0.0  ;;  %v310_v51 = vld [vmem:[%s882_s0 + $0x18] sm:$0xf] }
 0x189   :  { %v805_v53 = vpop.f32.mrb[2].mxu0  ;;  %v198_v56 = vsel %vm21_vm0, %v194_v52, 0.0  ;;  %638 = vmatprep.subr.msk.mxu1 %vm85_vm3, %v310_v51 }
 0x18a   :  { %v808_v55 = vpop.f32.mrb[3].mxu0  ;;  %v187_v57 = vsel %vm21_vm0, %v805_v53, 0.0  ;;  %v197_v59 = vmul.f32 %v805_v53, %v805_v53  ;;  %639 = vmatpush3.msk.msra.mxu1 %vm85_vm3, %v310_v51 }
 0x18b   :  { %202 = vadd.xlane.f32.xlu1 %v201_v54  ;;  %v184_v58 = vsel %vm21_vm0, %v808_v55, 0.0  ;;  %v196_v60 = vmul.f32 %v808_v55, %v808_v55  ;;  %641 = vmatmul.mubr.msk.f32.vlgmr.msra.gmra.mrb[0].mxu1 %vm315_vm4, %v175_v28 }
 0x18c   :  { %199 = vadd.xlane.f32.xlu0 %v198_v56  ;;  %v207_v61 = vsel %vm21_vm0, %v197_v59, 0.0  ;;  %643 = vmatprep.mubr.msk.f32.mxu1 %vm315_vm4, %v176_v36  ;;  %v733_v59 = vmov 6  }
 0x18d   :  { %v204_v62 = vsel %vm21_vm0, %v196_v60, 0.0  ;;  %v734_v60 = vmov 7  }
 0x18f   :  { %188 = vadd.xlane.f32.xlu1 %v187_v57  ;;  %644 = vmatmul.mubr.msk.f32.gmra.mrb[2].mxu1 %vm315_vm4, %v177_v39 }
 0x190   :  { %185 = vadd.xlane.f32.xlu0 %v184_v58  ;;  %v311_v58 = vld [vmem:[%s884_s2] sm:$0xff] }
 0x191   :  { %654 = vmatprep.mubr.msk.f32.mxu1 %vm416_vm5, %v311_v58 }
 0x193   :  { %208 = vadd.xlane.f32.xlu1 %v207_v61  ;;  %v735_v61 = vmov 8  }
 0x194   :  { %205 = vadd.xlane.f32.xlu0 %v204_v62 }
 0x214   :  { %v183_v0 = vpop.xlane.xlu1 %182 }
 0x215   :  { %v191_v1 = vmul.f32 0.125, %v183_v0  ;;  %v180_v2 = vpop.xlane.xlu0 %179 }
 0x216   :  { %v190_v3 = vmul.f32 0.125, %v180_v2 }
 0x217   :  { %v215_v5 = vmul.f32 %v191_v1, %v191_v1 }
 0x218   :  { %v203_v4 = vpop.xlane.xlu1 %202  ;;  %v214_v8 = vmul.f32 %v190_v3, %v190_v3 }
 0x219   :  { %v211_v6 = vmul.f32 0.125, %v203_v4  ;;  %v200_v7 = vpop.xlane.xlu0 %199 }
 0x21a   :  { %v210_v9 = vmul.f32 0.125, %v200_v7 }
 0x21b   :  { %v219_v10 = vsub.f32 %v211_v6, %v215_v5 }
 0x21c   :  { %v218_v11 = vsub.f32 %v210_v9, %v214_v8  ;;  %v189_v12 = vpop.xlane.xlu1 %188 }
 0x21d   :  { %v223_v13 = vadd.f32 1e-05, %v219_v10  ;;  %v193_v14 = vmul.f32 0.125, %v189_v12  ;;  %v186_v15 = vpop.xlane.xlu0 %185 }
 0x21e   :  { %v222_v16 = vadd.f32 1e-05, %v218_v11  ;;  %v192_v17 = vmul.f32 0.125, %v186_v15 }
 0x21f   :  { %698 = vrsqrt.f32 %v223_v13  ;;  %v217_v19 = vmul.f32 %v193_v14, %v193_v14 }
 0x220   :  { %700 = vrsqrt.f32 %v222_v16  ;;  %v209_v18 = vpop.xlane.xlu1 %208  ;;  %v216_v22 = vmul.f32 %v192_v17, %v192_v17 }
 0x221   :  { %v213_v20 = vmul.f32 0.125, %v209_v18  ;;  %v206_v21 = vpop.xlane.xlu0 %205  ;;  %v312_v18 = vld [vmem:[%s884_s2 + $0x8] sm:$0xff] }
 0x222   :  { %v212_v23 = vmul.f32 0.125, %v206_v21 }
 0x223   :  { %v221_v24 = vsub.f32 %v213_v20, %v217_v19  ;;  %v313_v19 = vld [vmem:[%s884_s2 + $0x10] sm:$0xff] }
 0x224   :  { %v220_v25 = vsub.f32 %v212_v23, %v216_v22 }
 0x225   :  { %v225_v26 = vadd.f32 1e-05, %v221_v24 }
 0x226   :  { %v224_v27 = vadd.f32 1e-05, %v220_v25 }
 0x227   :  { %702 = vrsqrt.f32 %v225_v26 }
 0x228   :  { %704 = vrsqrt.f32 %v224_v27 }
 0x229   :  { %v699_v30 = vpop.eup %698 }
 0x22a   :  { %v701_v31 = vpop.eup %700  ;;  %v231_v32 = vmul.f32 %v699_v30, %v175_v28 }
 0x22b   :  { %v230_v33 = vmul.f32 %v701_v31, %v827_v29 }
 0x22c   :  { %v235_v34 = vmul.f32 %v231_v32, %v191_v1 }
 0x22d   :  { %v234_v35 = vmul.f32 %v230_v33, %v190_v3 }
 0x22e   :  { %244 = vrot.lane.b32.xlu1 %v235_v34, %s731_s6 }
 0x22f   :  { %242 = vrot.lane.b32.xlu0 %v234_v35, %s731_s6 }
 0x231   :  { %v703_v37 = vpop.eup %702 }
 0x232   :  { %v705_v38 = vpop.eup %704  ;;  %v233_v42 = vmul.f32 %v703_v37, %v177_v39 }
 0x233   :  { %260 = vperm.xlu0 %683, %v230_v33   ;;  %v232_v40 = vmul.f32 %v705_v38, %v176_v36 }
 0x234   :  { %v237_v44 = vmul.f32 %v233_v42, %v193_v14 }
 0x235   :  { %v236_v41 = vmul.f32 %v232_v40, %v192_v17 }
 0x237   :  { %246 = vrot.lane.b32.xlu1 %v236_v41, %s731_s6  ;;  %685 = vset.pattern.permute.xlu0 %v732_v43 }
 0x23b   :  { %248 = vrot.lane.b32.xlu1 %v237_v44, %s731_s6 }
 0x23f   :  { %265 = vperm.xlu1 %684, %v231_v32  }
 0x243   :  { %270 = vperm.xlu1 %684, %v232_v40  }
 0x247   :  { %275 = vperm.xlu1 %684, %v233_v42  }
 0x24b   :  { %686 = vset.pattern.permute.xlu1 %v732_v43 }
 0x2a0   :  { %v245_v45 = vpop.permute.xlu1 %244 }
 0x2a1   :  { %v255_v46 = vsub.f32 %v175_v28, %v245_v45  ;;  %v243_v49 = vpop.permute.xlu0 %242 }
 0x2a2   :  { %v254_v50 = vsub.f32 %v827_v29, %v243_v49 }
 0x2a3   :  { %289 = vperm.xlu0 %685, %v255_v46  }
 0x2a4   :  { %284 = vperm.xlu1 %686, %v254_v50  }
 0x2a9   :  { %v247_v52 = vpop.permute.xlu1 %246 }
 0x2aa   :  { %v256_v54 = vsub.f32 %v176_v36, %v247_v52 }
 0x2ac   :  { %294 = vperm.xlu0 %685, %v256_v54  }
 0x2ad   :  { %v249_v56 = vpop.permute.xlu1 %248 }
 0x2ae   :  { %v257_v57 = vsub.f32 %v177_v39, %v249_v56 }
 0x2b0   :  { %299 = vperm.xlu1 %686, %v257_v57   ;;  %687 = vset.pattern.permute.xlu0 %v733_v59 }
 0x2b1   :  { %515 = vperm.xlu0 %687, %v827_v29  }
 0x2b2   :  { %v261_v0 = vpop.permute.xlu0 %260 }
 0x2b3   :  { %v278_v3 = vmul.f32 %v261_v0, %v795_v48 }
 0x2b4   :  { %688 = vset.pattern.permute.xlu1 %v733_v59 }
 0x2b5   :  { %519 = vperm.xlu1 %688, %v175_v28   ;;  %527 = vperm.xlu0 %687, %v177_v39  }
 0x2b9   :  { %523 = vperm.xlu1 %688, %v176_v36   ;;  %690 = vset.pattern.permute.xlu0 %v734_v60 }
 0x2ba   :  { %543 = vperm.xlu0 %690, %v175_v28  }
 0x2bd   :  { %689 = vset.pattern.permute.xlu1 %v734_v60 }
 0x2be   :  { %539 = vperm.xlu1 %689, %v827_v29   ;;  %691 = vset.pattern.permute.xlu0 %v735_v61  ;;  %v266_v62 = vpop.permute.xlu1 %265 }
 0x2bf   :  { %572 = vperm.xlu0 %691, %v827_v29   ;;  %v279_v2 = vmul.f32 %v793_v47, %v266_v62 }
 0x2c2   :  { %547 = vperm.xlu1 %689, %v176_v36   ;;  %v271_v63 = vpop.permute.xlu1 %270 }
 0x2c3   :  { %v280_v12 = vmul.f32 %v271_v63, %v808_v55 }
 0x2c6   :  { %551 = vperm.xlu1 %689, %v177_v39   ;;  %v276_v1 = vpop.permute.xlu1 %275 }
 0x2c7   :  { %v281_v13 = vmul.f32 %v805_v53, %v276_v1  ;;  %v314_v53 = vld [vmem:[%s884_s2 + $0x18] sm:$0xff]  ;;  %s736_s2 = smov [#allocation2]  }
 0x2c8   :  { %s584_s19 = sshll.u32 %s736_s2, 4  ;;  %s585_s19 = int_to_ptr.vmem [resolvable:$true] %s584_s19 }
 0x2c9   :  { %s706_s20 = scalar_lea.vmem %s585_s19, 16  ;;  %s710_s21 = scalar_lea.vmem %s585_s19, 32 }
 0x2ca   :  { %p707_p0 = scmp.ne.s32.totalorder %s585_s19, %s706_s20  ;;  %p711_p1 = scmp.lt.s32.totalorder %s585_s19, %s585_s19 }
 0x2cb   :  { %p712_p2 = scmp.lt.s32.totalorder %s710_s21, %s706_s20 }
 0x2cd   :  { %p713_p3 = por %p712_p2, %p711_p1 }
 0x2cf   :  { %p714_p4 = pnand %p713_p3, %p707_p0 }
 0x322   :  { %v290_v4 = vpop.permute.xlu0 %289 }
 0x323   :  { %v303_v5 = vadd.f32 %v290_v4, %v279_v2  ;;  %v285_v6 = vpop.permute.xlu1 %284 }
 0x324   :  { %v302_v7 = vadd.f32 %v285_v6, %v278_v3 }
 0x325   :  { %v307_v8 = vmax.f32 %v303_v5, 0.0 }
 0x326   :  { %v306_v9 = vmax.f32 %v302_v7, 0.0 }
 0x328   :  { %v664_v10 = vpack.c.bf16 %v307_v8, %v306_v9 }
 0x32a   :  { %665 = vmatprep.subr.bf16.mxu1 %v664_v10 }
 0x32b   :  { %667 = vmatpush3.bf16.msra.mxu1 %v664_v10  ;;  %v295_v11 = vpop.permute.xlu0 %294 }
 0x32c   :  { %v304_v14 = vadd.f32 %v295_v11, %v280_v12 }
 0x32e   :  { %v308_v47 = vmax.f32 %v304_v14, 0.0 }
 0x32f   :  { %v300_v15 = vpop.permute.xlu1 %299 }
 0x330   :  { %v305_v16 = vadd.f32 %v300_v15, %v281_v13  ;;  %v516_v21 = vpop.permute.xlu0 %515 }
 0x332   :  { %v309_v17 = vmax.f32 %v305_v16, 0.0 }
 0x334   :  { %v668_v48 = vpack.c.bf16 %v309_v17, %v308_v47  ;;  %v520_v55 = vpop.permute.xlu1 %519  ;;  %v528_v23 = vpop.permute.xlu0 %527 }
 0x336   :  { %669 = vmatprep.subr.bf16.mxu1 %v668_v48 }
 0x337   :  { %671 = vmatpush3.bf16.msra.mxu1 %v668_v48 }
 0x338   :  { %v524_v20 = vpop.permute.xlu1 %523 }
 0x339   :  { %v544_v28 = vpop.permute.xlu0 %543 }
 0x33a   :  { %655 = vmatmul.mubr.msk.f32.vlgmr.msra.gmra.mrb[0].mxu1 %vm416_vm5, %v312_v18 }
 0x33b   :  { %657 = vmatprep.mubr.msk.f32.mxu1 %vm416_vm5, %v313_v19 }
 0x33d   :  { %v540_v22 = vpop.permute.xlu1 %539 }
 0x33e   :  { %658 = vmatmul.mubr.msk.f32.gmra.mrb[2].mxu1 %vm416_vm5, %v314_v53  ;;  %v573_v59 = vpop.permute.xlu0 %572 }
 0x341   :  { %v548_v29 = vpop.permute.xlu1 %547 }
 0x345   :  { %v552_v42 = vpop.permute.xlu1 %551 }
 0x40d   :  { %v656_v24 = vpop.f32.mrb[0].mxu1 }
 0x40e   :  { %v531_v25 = vadd.f32 %v656_v24, %v520_v55  ;;  %v495_v26 = vpop.f32.mrb[1].mxu1 }
 0x40f   :  { %v530_v27 = vadd.f32 %v516_v21, %v495_v26 }
 0x410   :  { %v535_v30 = vmax.f32 %v531_v25, 0.0 }
 0x411   :  { %v534_v31 = vmax.f32 %v530_v27, 0.0  ;;  %v659_v32 = vpop.f32.mrb[2].mxu1 }
 0x412   :  { %v533_v33 = vadd.f32 %v659_v32, %v528_v23  ;;  %v555_v34 = vmul.f32 %v544_v28, %v535_v30  ;;  %v505_v35 = vpop.f32.mrb[3].mxu1 }
 0x413   :  { %v554_v36 = vmul.f32 %v540_v22, %v534_v31  ;;  %v532_v37 = vadd.f32 %v524_v20, %v505_v35 }
 0x414   :  { %v537_v38 = vmax.f32 %v533_v33, 0.0  ;;  %v559_v39 = vsel %vm21_vm0, %v555_v34, 0.0 }
 0x415   :  { %v558_v40 = vsel %vm21_vm0, %v554_v36, 0.0  ;;  %v536_v41 = vmax.f32 %v532_v37, 0.0 }
 0x416   :  { %v560_v43 = vadd.f32 %v559_v39, %v558_v40  ;;  %v557_v44 = vmul.f32 %v552_v42, %v537_v38 }
 0x417   :  { %v556_v45 = vmul.f32 %v548_v29, %v536_v41 }
 0x418   :  { %v563_v50 = vsel %vm21_vm0, %v557_v44, 0.0 }
 0x419   :  { %v561_v46 = vsel %vm21_vm0, %v556_v45, 0.0 }
 0x41a   :  { %v562_v49 = vadd.f32 %v561_v46, %v560_v43 }
 0x41c   :  { %v564_v51 = vadd.f32 %v563_v50, %v562_v49 }
 0x41e   :  { %v565_v52 = vrot.slane %v564_v51, 4 }
 0x420   :  { %v566_v54 = vadd.f32 %v565_v52, %v564_v51 }
 0x422   :  { %v567_v56 = vrot.slane %v566_v54, 2 }
 0x424   :  { %v568_v57 = vadd.f32 %v567_v56, %v566_v54 }
 0x426   :  { %v569_v58 = vrot.slane %v568_v57, 1 }
 0x428   :  { %v570_v60 = vadd.f32 %v569_v58, %v568_v57 }
 0x42a   :  { %v575_v61 = vadd.f32 %v573_v59, %v570_v60 }
 0x42c   :  { %577 = vst.msk [vmem:[#allocation2] sm:$0x1] %vm576_vm6, %v575_v61 }
 0x42d   :  { %717 = shalt.err (!%p714_p4)
}
 0x42e   :  { %s718_s24 = scalar_lea.hbm %s886_s4, 16 }
 0x42f   :  { %p719_p5 = scmp.ne.s32.totalorder %s886_s4, %s718_s24  ;;  %p722_p6 = scmp.lt.u32.totalorder %s718_s24, %s886_s4 }
 0x431   :  { %p724_p7 = pnand %p722_p6, %p719_p5 }
 0x433   :  { %727 = shalt.err (!%p724_p7)
}
 0x434   :  { %587 = dma.vmem_to_hbm [thread:$0]  %s585_s19, 16, %s886_s4, [#allocation3]  }
 0x435   :  { %728 = dma.done.wait [#allocation3], 16  }
 0x436   :  { %729 = vsyncadd [#allocation3], 4294967280 }
 0x437   :  { %591 = vsyncpa [#allocation3], 1 }

</bundles_post_ra>
